<compile_context>
chip_gen: v7x
topology: tpu7x:2x2x1
jax: 0.10.0
libtpu: 0.0.40
codegen_flags: <defaults>
</compile_context>

<pallas_src>
import numpy as np
import jax
import jax.numpy as jnp
from jax import lax
from jax.experimental import pallas as pl
from jax.experimental.pallas import tpu as pltpu


def _round_up(n, m):
    return ((n + m - 1) // m) * m


def _decoder_kernel(x_ref, wfc_ref, bfc_ref, wd1_ref, bd1_ref,
                    md2_ref, bd2_ref, wlin_ref, blin_ref, o_ref):
    """Fused decoder forward.

    x_ref   : (tb, E)  batch-major input tile (E on the lane axis)
    w*_ref  : bf16 (out, in) matmul operands (BatchNorm already folded in)
    b*_ref  : f32 (out, 1) bias columns (broadcast along lanes)
    o_ref   : f32 (O, tb) feature-major output tile (lane-dense stores)
    """
    x = x_ref[...].astype(jnp.bfloat16)

    # fc: Linear (+folded BatchNorm1d) -> ReLU.
    # Contract E (lane axis of x) against E (lane axis of wfc): result is
    # feature-major (64, tb) so everything downstream stays lane-dense.
    h = lax.dot_general(wfc_ref[...], x,
                        dimension_numbers=(((1,), (1,)), ((), ())),
                        preferred_element_type=jnp.float32)
    h = jnp.maximum(h + bfc_ref[...], 0.0)

    # deconv layer 1: ConvTranspose1d on a length-1 signal == matmul; LeakyReLU(0.01)
    h = jnp.dot(wd1_ref[...], h.astype(jnp.bfloat16),
                preferred_element_type=jnp.float32) + bd1_ref[...]
    h = jnp.where(h > 0, h, 0.01 * h)

    # deconv layer 2: ConvTranspose1d folded into a Toeplitz matmul; LeakyReLU(0.01)
    h = jnp.dot(md2_ref[...], h.astype(jnp.bfloat16),
                preferred_element_type=jnp.float32) + bd2_ref[...]
    h = jnp.where(h > 0, h, 0.01 * h)

    # linear: Linear (+folded BatchNorm1d) -> Sigmoid (EUP exp + approx reciprocal)
    h = jnp.dot(wlin_ref[...], h.astype(jnp.bfloat16),
                preferred_element_type=jnp.float32) + blin_ref[...]
    o_ref[...] = pl.reciprocal(1.0 + jnp.exp(-h), approx=True)


def cnn_1d_decoder_forward(x, params, *, batch_tile=8192, feature_major_out=False):
    """x: (B, embedding_size) float32 -> (B, output_size) float32
    (or (output_size, B) when feature_major_out=True)."""
    B, E = x.shape
    out_size = params["wlin_t"].shape[0]
    fc_dim = params["wfc_t"].shape[0]
    d1p = params["wd1_t"].shape[0]
    d2p = params["md2_t"].shape[0]

    # Batch tile: lane-dense (multiple of 128), large enough to amortize the
    # ~0.35us/step Pallas overhead and per-step MXU weight pushes, capped so a
    # v7x chip's two TensorCores both get at least one tile, and small enough
    # (with bf16 x + f32 intermediates) to fit v5e's scoped VMEM with the
    # 32 MiB limit below.
    tb = min(int(batch_tile), _round_up(pl.cdiv(B, 2), 128))
    tb = max(128, (tb // 128) * 128)
    grid = (pl.cdiv(B, tb),)   # ragged last tile handled by bounded DMA

    weights = (params["wfc_t"], params["bfc_t"],
               params["wd1_t"], params["bd1_t"],
               params["md2_t"], params["bd2_t"],
               params["wlin_t"], params["blin_t"])

    def const_spec(a):
        return pl.BlockSpec(a.shape, lambda i: (0, 0))   # VMEM-resident across grid

    in_specs = ([pl.BlockSpec((tb, E), lambda i: (i, 0))]     # x stays batch-major
                + [const_spec(w) for w in weights])
    out_specs = pl.BlockSpec((out_size, tb), lambda i: (0, i))

    flops = 2 * B * (E * fc_dim + fc_dim * d1p + d1p * d2p + d2p * out_size)
    weight_bytes = sum(int(np.prod(w.shape)) * w.dtype.itemsize for w in weights)
    cost = pl.CostEstimate(
        flops=flops,
        transcendentals=B * out_size,
        bytes_accessed=B * E * x.dtype.itemsize + 4 * B * out_size + weight_bytes,
    )

    out_t = pl.pallas_call(
        _decoder_kernel,
        out_shape=jax.ShapeDtypeStruct((out_size, B), jnp.float32),
        grid=grid,
        in_specs=in_specs,
        out_specs=out_specs,
        compiler_params=pltpu.CompilerParams(
            dimension_semantics=("parallel",),      # megacore sharding on v7x
            vmem_limit_bytes=32 * 1024 * 1024),     # v5e scoped default is 16 MiB
        cost_estimate=cost,
    )(x, *weights)

    if feature_major_out:
        return out_t            # (O, B): no extra HBM pass; consumer stays feature-major
    return out_t.T              # (B, O): single XLA transpose to match the PyTorch module


def init_params(key, embedding_size, output_size, l1_kernel_size, channel_mult):
    fc_dim = 64
    k = l1_kernel_size
    flat_fts = 2 * k - 1          # == int(np.prod(deconv(ones(1, 64, 1)).shape[1:]))
    d1 = channel_mult * k
    d1p = _round_up(d1, 8)        # padded deconv1 feature rows
    d2p = _round_up(flat_fts, 8)  # padded deconv2 feature rows
    eps = 1e-5
    keys = jax.random.split(key, 8)

    # fc Linear(embedding_size -> 64); weight stored as (in, out)
    wfc = jax.random.normal(keys[0], (embedding_size, fc_dim), jnp.float32) * 0.1
    bfc = jax.random.normal(keys[1], (1, fc_dim), jnp.float32) * 0.1

    # BatchNorm1d(64), eval mode, default init (gamma=1, beta=0, rm=0, rv=1)
    g1, be1 = np.ones(fc_dim, np.float32), np.zeros(fc_dim, np.float32)
    rm1, rv1 = np.zeros(fc_dim, np.float32), np.ones(fc_dim, np.float32)
    bn1s = g1 / np.sqrt(rv1 + eps)
    bn1b = be1 - rm1 * bn1s

    # ConvTranspose1d(64 -> channel_mult, k): weight (in, out, k)
    w1 = jax.random.normal(keys[2], (fc_dim, channel_mult, k), jnp.float32) * 0.1
    b1 = jax.random.normal(keys[3], (channel_mult,), jnp.float32) * 0.1
    wd1 = np.asarray(w1).reshape(fc_dim, d1)          # flatten (oc, l) -> oc*k+l
    bd1 = np.repeat(np.asarray(b1), k)                # (channel_mult*k,)

    # ConvTranspose1d(channel_mult -> 1, k): weight (in, 1, k) folded to Toeplitz
    w2 = jax.random.normal(keys[4], (channel_mult, 1, k), jnp.float32) * 0.1
    b2 = jax.random.normal(keys[5], (1,), jnp.float32) * 0.1
    w2_np = np.asarray(w2)
    md2 = np.zeros((d1, flat_fts), np.float32)
    for ic in range(channel_mult):
        for j in range(k):
            md2[ic * k + j, j:j + k] = w2_np[ic, 0, :]   # out[l] += x[ic, j] * W[ic, 0, l-j]
    bd2 = np.full(flat_fts, float(np.asarray(b2)[0]), np.float32)

    # linear: Linear(flat_fts -> output_size) + BatchNorm1d(output_size)
    wlin = jax.random.normal(keys[6], (flat_fts, output_size), jnp.float32) * 0.1
    blin = jax.random.normal(keys[7], (1, output_size), jnp.float32) * 0.1
    g2, be2 = np.ones(output_size, np.float32), np.zeros(output_size, np.float32)
    rm2, rv2 = np.zeros(output_size, np.float32), np.ones(output_size, np.float32)
    bn2s = g2 / np.sqrt(rv2 + eps)
    bn2b = be2 - rm2 * bn2s

    # ---- fold the (eval-mode) BatchNorms into the adjacent matmuls.
    wfc_np, bfc_np = np.asarray(wfc), np.asarray(bfc)
    wlin_np, blin_np = np.asarray(wlin), np.asarray(blin)
    wfc_f = wfc_np * bn1s[None, :]
    bfc_f = bfc_np[0] * bn1s + bn1b
    wlin_f = wlin_np * bn2s[None, :]
    blin_f = blin_np[0] * bn2s + bn2b

    # ---- transpose to the (out_features, in_features) kernel layout and
    # ---- zero-pad the odd feature dims to multiples of 8 (math stays exact:
    # ---- padded rows carry zero weights AND zero biases -> zero activations;
    # ---- the matching consumer columns are zero as well).
    wd1_t = np.zeros((d1p, fc_dim), np.float32); wd1_t[:d1] = wd1.T
    bd1_p = np.zeros(d1p, np.float32);           bd1_p[:d1] = bd1
    md2_t = np.zeros((d2p, d1p), np.float32);    md2_t[:flat_fts, :d1] = md2.T
    bd2_p = np.zeros(d2p, np.float32);           bd2_p[:flat_fts] = bd2
    wlin_t = np.zeros((output_size, d2p), np.float32); wlin_t[:, :flat_fts] = wlin_f.T

    bf16 = jnp.bfloat16
    params = dict(
        wfc_t=jnp.asarray(wfc_f.T, bf16),                     # (64, E)   bf16
        bfc_t=jnp.asarray(bfc_f.reshape(-1, 1), jnp.float32),  # (64, 1)   f32
        wd1_t=jnp.asarray(wd1_t, bf16),                       # (d1p, 64) bf16
        bd1_t=jnp.asarray(bd1_p.reshape(-1, 1), jnp.float32),  # (d1p, 1)  f32
        md2_t=jnp.asarray(md2_t, bf16),                       # (d2p, d1p) bf16
        bd2_t=jnp.asarray(bd2_p.reshape(-1, 1), jnp.float32),  # (d2p, 1)  f32
        wlin_t=jnp.asarray(wlin_t, bf16),                     # (O, d2p)  bf16
        blin_t=jnp.asarray(blin_f.reshape(-1, 1), jnp.float32),  # (O, 1)  f32
    )
    # raw (PyTorch-shaped) params kept for the numpy reference check
    raw = dict(wfc=wfc_np, bfc=bfc_np, g1=g1, be1=be1, rm1=rm1, rv1=rv1,
               w1=np.asarray(w1), b1=np.asarray(b1), w2=w2_np, b2=np.asarray(b2),
               wlin=wlin_np, blin=blin_np, g2=g2, be2=be2, rm2=rm2, rv2=rv2,
               k=k, cm=channel_mult)
    return params, raw


def numpy_reference(x, raw):
    """Direct transcription of the PyTorch forward (eval-mode BatchNorm)."""
    eps = 1e-5
    k = raw["k"]
    h = x @ raw["wfc"] + raw["bfc"][0]
    h = (h - raw["rm1"]) / np.sqrt(raw["rv1"] + eps) * raw["g1"] + raw["be1"]
    h = np.maximum(h, 0.0)                                   # (B, 64)
    B = h.shape[0]
    # ConvTranspose1d #1 on (B, 64, 1): out[b, oc, l] = sum_ic x[b, ic] * W[ic, oc, l]
    y1 = np.stack([h @ raw["w1"][:, :, l] for l in range(k)], axis=-1)  # (B, cm, k)
    y1 = y1 + raw["b1"][None, :, None]
    y1 = np.where(y1 > 0, y1, 0.01 * y1)
    # ConvTranspose1d #2: (B, cm, k) -> (B, 2k-1)
    Lout = 2 * k - 1
    y2 = np.zeros((B, Lout), np.float32)
    for l in range(Lout):
        for j in range(k):
            t = l - j
            if 0 <= t < k:
                y2[:, l] += y1[:, :, j] @ raw["w2"][:, 0, t]
    y2 = y2 + raw["b2"][0]
    y2 = np.where(y2 > 0, y2, 0.01 * y2)
    h = y2 @ raw["wlin"] + raw["blin"][0]
    h = (h - raw["rm2"]) / np.sqrt(raw["rv2"] + eps) * raw["g2"] + raw["be2"]
    return 1.0 / (1.0 + np.exp(-h))


if __name__ == "__main__":
    embedding_size = 32
    output_size = 16
    l1_kernel_size = 5
    channel_mult = 10
    batch = 8

    key = jax.random.PRNGKey(0)
    k_x, k_p = jax.random.split(key)
    x = jax.random.normal(k_x, (batch, embedding_size), jnp.float32)

    params, raw = init_params(k_p, embedding_size, output_size,
                              l1_kernel_size, channel_mult)

    out = cnn_1d_decoder_forward(x, params)   # (B, output_size), PyTorch semantics
    out = jax.block_until_ready(out)

    ref = numpy_reference(np.asarray(x), raw)
    # bf16 MXU operands + approx reciprocal: observed error ~1e-3 or better.
    np.testing.assert_allclose(np.asarray(out), ref, rtol=2e-3, atol=2e-3)

    print("KERNEL_OK")
</pallas_src>

<mosaic_0001>
module attributes {stable_mosaic.version = 11 : i64} {
  func.func @_decoder_kernel(%arg0: i32, %arg1: memref<128x32xf32, #tpu.memory_space<vmem>>, %arg2: memref<64x32xbf16, #tpu.memory_space<vmem>>, %arg3: memref<64x1xf32, #tpu.memory_space<vmem>>, %arg4: memref<56x64xbf16, #tpu.memory_space<vmem>>, %arg5: memref<56x1xf32, #tpu.memory_space<vmem>>, %arg6: memref<16x56xbf16, #tpu.memory_space<vmem>>, %arg7: memref<16x1xf32, #tpu.memory_space<vmem>>, %arg8: memref<16x16xbf16, #tpu.memory_space<vmem>>, %arg9: memref<16x1xf32, #tpu.memory_space<vmem>>, %arg10: memref<16x128xf32, #tpu.memory_space<vmem>>) attributes {dimension_semantics = [#tpu.dimension_semantics<parallel>], iteration_bounds = array<i64: 1>, scalar_prefetch = 0 : i64, scratch_operands = 0 : i64, tpu.core_type = #tpu.core_type<tc>, window_params = [{transform_indices = @transform_0, window_bounds = array<i64: 128, 32>}, {pipeline_mode = #tpu.pipeline_mode<synchronous>, transform_indices = @transform_1, window_bounds = array<i64: 64, 32>}, {pipeline_mode = #tpu.pipeline_mode<synchronous>, transform_indices = @transform_2, window_bounds = array<i64: 64, 1>}, {pipeline_mode = #tpu.pipeline_mode<synchronous>, transform_indices = @transform_3, window_bounds = array<i64: 56, 64>}, {pipeline_mode = #tpu.pipeline_mode<synchronous>, transform_indices = @transform_4, window_bounds = array<i64: 56, 1>}, {pipeline_mode = #tpu.pipeline_mode<synchronous>, transform_indices = @transform_5, window_bounds = array<i64: 16, 56>}, {pipeline_mode = #tpu.pipeline_mode<synchronous>, transform_indices = @transform_6, window_bounds = array<i64: 16, 1>}, {pipeline_mode = #tpu.pipeline_mode<synchronous>, transform_indices = @transform_7, window_bounds = array<i64: 16, 16>}, {pipeline_mode = #tpu.pipeline_mode<synchronous>, transform_indices = @transform_8, window_bounds = array<i64: 16, 1>}, {transform_indices = @transform_9, window_bounds = array<i64: 16, 128>}]} {
    %c0 = arith.constant 0 : index
    %c0_0 = arith.constant 0 : index
    %0 = vector.load %arg1[%c0, %c0_0] : memref<128x32xf32, #tpu.memory_space<vmem>>, vector<128x32xf32>
    %1 = arith.truncf %0 : vector<128x32xf32> to vector<128x32xbf16>
    %c0_1 = arith.constant 0 : index
    %c0_2 = arith.constant 0 : index
    %2 = vector.load %arg2[%c0_1, %c0_2] : memref<64x32xbf16, #tpu.memory_space<vmem>>, vector<64x32xbf16>
    %cst = arith.constant dense<0.000000e+00> : vector<64x128xf32>
    %3 = tpu.matmul %2, %1, %cst {dimension_numbers = #tpu.dot_dimension_numbers<[1], [1], [0], [0], [0, 0, 1, 0], [], []>} : vector<64x32xbf16>, vector<128x32xbf16>, vector<64x128xf32> -> vector<64x128xf32>
    %c0_3 = arith.constant 0 : index
    %c0_4 = arith.constant 0 : index
    %4 = vector.load %arg3[%c0_3, %c0_4] : memref<64x1xf32, #tpu.memory_space<vmem>>, vector<64x1xf32>
    %5 = vector.broadcast %4 : vector<64x1xf32> to vector<64x128xf32>
    %6 = arith.addf %3, %5 : vector<64x128xf32>
    %cst_5 = arith.constant 0.000000e+00 : f32
    %7 = vector.broadcast %cst_5 : f32 to vector<64x128xf32>
    %8 = arith.maximumf %6, %7 : vector<64x128xf32>
    %c0_6 = arith.constant 0 : index
    %c0_7 = arith.constant 0 : index
    %9 = vector.load %arg4[%c0_6, %c0_7] : memref<56x64xbf16, #tpu.memory_space<vmem>>, vector<56x64xbf16>
    %10 = arith.truncf %8 : vector<64x128xf32> to vector<64x128xbf16>
    %cst_8 = arith.constant dense<0.000000e+00> : vector<56x128xf32>
    %11 = tpu.matmul %9, %10, %cst_8 {dimension_numbers = #tpu.dot_dimension_numbers<[1], [0], [0], [1], [0, 0, 1, 1], [], []>} : vector<56x64xbf16>, vector<64x128xbf16>, vector<56x128xf32> -> vector<56x128xf32>
    %c0_9 = arith.constant 0 : index
    %c0_10 = arith.constant 0 : index
    %12 = vector.load %arg5[%c0_9, %c0_10] : memref<56x1xf32, #tpu.memory_space<vmem>>, vector<56x1xf32>
    %13 = vector.broadcast %12 : vector<56x1xf32> to vector<56x128xf32>
    %14 = arith.addf %11, %13 : vector<56x128xf32>
    %cst_11 = arith.constant 0.000000e+00 : f32
    %15 = vector.broadcast %cst_11 : f32 to vector<56x128xf32>
    %16 = arith.cmpf ogt, %14, %15 : vector<56x128xf32>
    %cst_12 = arith.constant 0.00999999977 : f32
    %17 = vector.broadcast %cst_12 : f32 to vector<56x128xf32>
    %18 = arith.mulf %17, %14 : vector<56x128xf32>
    %19 = arith.select %16, %14, %18 : vector<56x128xi1>, vector<56x128xf32>
    %c0_13 = arith.constant 0 : index
    %c0_14 = arith.constant 0 : index
    %20 = vector.load %arg6[%c0_13, %c0_14] : memref<16x56xbf16, #tpu.memory_space<vmem>>, vector<16x56xbf16>
    %21 = arith.truncf %19 : vector<56x128xf32> to vector<56x128xbf16>
    %cst_15 = arith.constant dense<0.000000e+00> : vector<16x128xf32>
    %22 = tpu.matmul %20, %21, %cst_15 {dimension_numbers = #tpu.dot_dimension_numbers<[1], [0], [0], [1], [0, 0, 1, 1], [], []>} : vector<16x56xbf16>, vector<56x128xbf16>, vector<16x128xf32> -> vector<16x128xf32>
    %c0_16 = arith.constant 0 : index
    %c0_17 = arith.constant 0 : index
    %23 = vector.load %arg7[%c0_16, %c0_17] : memref<16x1xf32, #tpu.memory_space<vmem>>, vector<16x1xf32>
    %24 = vector.broadcast %23 : vector<16x1xf32> to vector<16x128xf32>
    %25 = arith.addf %22, %24 : vector<16x128xf32>
    %cst_18 = arith.constant 0.000000e+00 : f32
    %26 = vector.broadcast %cst_18 : f32 to vector<16x128xf32>
    %27 = arith.cmpf ogt, %25, %26 : vector<16x128xf32>
    %cst_19 = arith.constant 0.00999999977 : f32
    %28 = vector.broadcast %cst_19 : f32 to vector<16x128xf32>
    %29 = arith.mulf %28, %25 : vector<16x128xf32>
    %30 = arith.select %27, %25, %29 : vector<16x128xi1>, vector<16x128xf32>
    %c0_20 = arith.constant 0 : index
    %c0_21 = arith.constant 0 : index
    %31 = vector.load %arg8[%c0_20, %c0_21] : memref<16x16xbf16, #tpu.memory_space<vmem>>, vector<16x16xbf16>
    %32 = arith.truncf %30 : vector<16x128xf32> to vector<16x128xbf16>
    %cst_22 = arith.constant dense<0.000000e+00> : vector<16x128xf32>
    %33 = tpu.matmul %31, %32, %cst_22 {dimension_numbers = #tpu.dot_dimension_numbers<[1], [0], [0], [1], [0, 0, 1, 1], [], []>} : vector<16x16xbf16>, vector<16x128xbf16>, vector<16x128xf32> -> vector<16x128xf32>
    %c0_23 = arith.constant 0 : index
    %c0_24 = arith.constant 0 : index
    %34 = vector.load %arg9[%c0_23, %c0_24] : memref<16x1xf32, #tpu.memory_space<vmem>>, vector<16x1xf32>
    %35 = vector.broadcast %34 : vector<16x1xf32> to vector<16x128xf32>
    %36 = arith.addf %33, %35 : vector<16x128xf32>
    %cst_25 = arith.constant 0.000000e+00 : f32
    %37 = vector.broadcast %cst_25 : f32 to vector<16x128xf32>
    %38 = arith.subf %37, %36 : vector<16x128xf32>
    %39 = math.exp %38 : vector<16x128xf32>
    %cst_26 = arith.constant 1.000000e+00 : f32
    %40 = vector.broadcast %cst_26 : f32 to vector<16x128xf32>
    %41 = arith.addf %40, %39 : vector<16x128xf32>
    %42 = tpu.reciprocal %41 {approx = true} : vector<16x128xf32> -> vector<16x128xf32>
    %c0_27 = arith.constant 0 : index
    %c0_28 = arith.constant 0 : index
    %43 = vector.load %arg10[%c0_27, %c0_28] : memref<16x128xf32, #tpu.memory_space<vmem>>, vector<16x128xf32>
    tpu.vector_store %arg10[%c0_27, %c0_28], %42 {strides = array<i32>} : memref<16x128xf32, #tpu.memory_space<vmem>>, vector<16x128xf32>,
    return
  }
  func.func @transform_0(%arg0: i32) -> (i32, i32) {
    %c0_i32 = arith.constant 0 : i32
    %c0_i32_0 = arith.constant 0 : i32
    return %arg0, %c0_i32 : i32, i32
  }
  func.func @transform_1(%arg0: i32) -> (i32, i32) {
    %c0_i32 = arith.constant 0 : i32
    %c0_i32_0 = arith.constant 0 : i32
    %c0_i32_1 = arith.constant 0 : i32
    return %c0_i32, %c0_i32_0 : i32, i32
  }
  func.func @transform_2(%arg0: i32) -> (i32, i32) {
    %c0_i32 = arith.constant 0 : i32
    %c0_i32_0 = arith.constant 0 : i32
    %c0_i32_1 = arith.constant 0 : i32
    return %c0_i32, %c0_i32_0 : i32, i32
  }
  func.func @transform_3(%arg0: i32) -> (i32, i32) {
    %c0_i32 = arith.constant 0 : i32
    %c0_i32_0 = arith.constant 0 : i32
    %c0_i32_1 = arith.constant 0 : i32
    return %c0_i32, %c0_i32_0 : i32, i32
  }
  func.func @transform_4(%arg0: i32) -> (i32, i32) {
    %c0_i32 = arith.constant 0 : i32
    %c0_i32_0 = arith.constant 0 : i32
    %c0_i32_1 = arith.constant 0 : i32
    return %c0_i32, %c0_i32_0 : i32, i32
  }
  func.func @transform_5(%arg0: i32) -> (i32, i32) {
    %c0_i32 = arith.constant 0 : i32
    %c0_i32_0 = arith.constant 0 : i32
    %c0_i32_1 = arith.constant 0 : i32
    return %c0_i32, %c0_i32_0 : i32, i32
  }
  func.func @transform_6(%arg0: i32) -> (i32, i32) {
    %c0_i32 = arith.constant 0 : i32
    %c0_i32_0 = arith.constant 0 : i32
    %c0_i32_1 = arith.constant 0 : i32
    return %c0_i32, %c0_i32_0 : i32, i32
  }
  func.func @transform_7(%arg0: i32) -> (i32, i32) {
    %c0_i32 = arith.constant 0 : i32
    %c0_i32_0 = arith.constant 0 : i32
    %c0_i32_1 = arith.constant 0 : i32
    return %c0_i32, %c0_i32_0 : i32, i32
  }
  func.func @transform_8(%arg0: i32) -> (i32, i32) {
    %c0_i32 = arith.constant 0 : i32
    %c0_i32_0 = arith.constant 0 : i32
    %c0_i32_1 = arith.constant 0 : i32
    return %c0_i32, %c0_i32_0 : i32, i32
  }
  func.func @transform_9(%arg0: i32) -> (i32, i32) {
    %c0_i32 = arith.constant 0 : i32
    %c0_i32_0 = arith.constant 0 : i32
    return %c0_i32, %arg0 : i32, i32
  }
}

</mosaic_0001>

<bundles_post_ra>
// kernel: tpu_custom_call.1
= control target key start
LH: loop header
LB: loop body
LE: loop exit
PB: predicated region body
PF: predicated region fallthrough
CT: control target
= control target key end

     0   :  { %vm133_vm0 = vcmask 261120   ;;  %v707_v3 = vmov 0   ;;  %vm314_vm1 = vcmask 523264   ;;  %vm709_vm2 = vmmov 0   ;;  %s934_s0 = inlined_call_operand.vmem [shape: f32[8,32], index: 0, kind: input, shape index: {}]   ;;  %s935_s1 = inlined_call_operand.vmem [shape: bf16[64,32], index: 1, kind: input, shape index: {}]   ;;  %s936_s2 = inlined_call_operand.vmem [shape: f32[64,1], index: 2, kind: input, shape index: {}]   ;;  %s937_s4 = inlined_call_operand.vmem [shape: f32[56,1], index: 4, kind: input, shape index: {}]   ;;  %s938_s6 = inlined_call_operand.vmem [shape: f32[16,1], index: 6, kind: input, shape index: {}]   ;;  %s939_s8 = inlined_call_operand.vmem [shape: f32[16,1], index: 8, kind: input, shape index: {}]   ;;  %s940_s3 = inlined_call_operand.vmem [shape: bf16[56,64], index: 3, kind: input, shape index: {}]   ;;  %s941_s5 = inlined_call_operand.vmem [shape: bf16[16,56], index: 5, kind: input, shape index: {}]   ;;  %s942_s7 = inlined_call_operand.vmem [shape: bf16[16,16], index: 7, kind: input, shape index: {}]   ;;  %s943_s9 = inlined_call_operand.vmem [shape: f32[16,8], index: 9, kind: output, shape index: {}]  }
   0x1   :  { %v33_v0 = vld [vmem:[%s934_s0] sm:$0xff]  ;;  %v34_v1 = vld [vmem:[%s934_s0 + $0x8] sm:$0xff]  ;;  %v35_v2 = vld [vmem:[%s934_s0 + $0x10] sm:$0xff]  ;;  %687 = vset.pattern.permute.xlu0 %v707_v3  ;;  %688 = vset.pattern.permute.xlu1 %v707_v3  ;;  %vm439_vm10 = vcmask 1043456   ;;  %vm435_vm11 = vcmask 457728   ;;  %vm510_vm14 = vcmask 130048  }
   0x2   :  { %v49_v4 = vpack.c.bf16 %v34_v1, %v33_v0  ;;  %v36_v5 = vld [vmem:[%s934_s0 + $0x18] sm:$0xff]  ;;  %v37_v8 = vld [vmem:[%s934_s0 + $0x20] sm:$0xff]  ;;  %v38_v9 = vld [vmem:[%s934_s0 + $0x28] sm:$0xff] }
   0x3   :  { %v50_v6 = vpack.c.bf16 %v36_v5, %v35_v2  ;;  %v689_v10 = vld [vmem:[%s935_s1] sm:$0xff]   ;;  %v51_v12 = vpack.c.bf16 %v38_v9, %v37_v8  ;;  %v67_v14 = vld [vmem:[%s936_s2 + $0x10] sm:$0xff]  ;;  %v66_v15 = vld [vmem:[%s936_s2 + $0x8] sm:$0xff] }
   0x4   :  { %676 = vmatprep.subr.msk.bf16.mxu0 %vm133_vm0, %v49_v4  ;;  %v147_v7 = vsel %vm133_vm0, %v49_v4, 0  ;;  %634 = vmatprep.mubr.msk.bf16.mxu0 %vm133_vm0, %v689_v10  ;;  %v65_v13 = vld [vmem:[%s936_s2] sm:$0xff]  ;;  %v68_v16 = vld [vmem:[%s936_s2 + $0x18] sm:$0xff]  ;;  %v39_v17 = vld [vmem:[%s934_s0 + $0x30] sm:$0xff] }
   0x5   :  { %619 = vmatpush3.bf16.xpose.msra.mxu0 %v147_v7  ;;  %v150_v11 = vsel %vm133_vm0, %v50_v6, 0  ;;  %75 = vperm.xlu0 %687, %v65_v13   ;;  %v40_v18 = vld [vmem:[%s934_s0 + $0x38] sm:$0xff]  ;;  %v69_v19 = vld [vmem:[%s936_s2 + $0x20] sm:$0xff]  ;;  %v70_v20 = vld [vmem:[%s936_s2 + $0x28] sm:$0xff]  ;;  %v153_v21 = vsel %vm133_vm0, %v51_v12, 0 }
   0x6   :  { %677 = vmatprep.subr.msk.bf16.mxu0 %vm133_vm0, %v50_v6  ;;  %85 = vperm.xlu1 %688, %v67_v14   ;;  %v52_v22 = vpack.c.bf16 %v40_v18, %v39_v17  ;;  %v71_v23 = vld [vmem:[%s936_s2 + $0x30] sm:$0xff]  ;;  %v72_v24 = vld [vmem:[%s936_s2 + $0x38] sm:$0xff]  ;;  %v41_v25 = vld [vmem:[%s934_s0 + $0x40] sm:$0xff] }
   0x7   :  { %v42_v26 = vld [vmem:[%s934_s0 + $0x48] sm:$0xff]  ;;  %v254_v27 = vld [vmem:[%s937_s4] sm:$0xff]  ;;  %v256_v31 = vld [vmem:[%s937_s4 + $0x10] sm:$0xff] }
   0x8   :  { %v255_v28 = vld [vmem:[%s937_s4 + $0x8] sm:$0xff]  ;;  %v156_v29 = vsel %vm133_vm0, %v52_v22, 0  ;;  %v53_v30 = vpack.c.bf16 %v42_v26, %v41_v25  ;;  %v257_v32 = vld [vmem:[%s937_s4 + $0x18] sm:$0xff]  ;;  %v43_v33 = vld [vmem:[%s934_s0 + $0x50] sm:$0xff] }
   0x9   :  { %80 = vperm.xlu0 %687, %v66_v15   ;;  %v44_v34 = vld [vmem:[%s934_s0 + $0x58] sm:$0xff]  ;;  %v258_v35 = vld [vmem:[%s937_s4 + $0x20] sm:$0xff]  ;;  %v259_v36 = vld [vmem:[%s937_s4 + $0x28] sm:$0xff] }
   0xa   :  { %90 = vperm.xlu1 %688, %v68_v16   ;;  %v159_v37 = vsel %vm133_vm0, %v53_v30, 0  ;;  %v54_v38 = vpack.c.bf16 %v44_v34, %v43_v33  ;;  %v260_v39 = vld [vmem:[%s937_s4 + $0x30] sm:$0xff]  ;;  %v418_v40 = vld [vmem:[%s938_s6] sm:$0xff]  ;;  %v46_v42 = vld [vmem:[%s934_s0 + $0x68] sm:$0xff] }
   0xb   :  { %v45_v41 = vld [vmem:[%s934_s0 + $0x60] sm:$0xff]  ;;  %v419_v43 = vld [vmem:[%s938_s6 + $0x8] sm:$0xff]  ;;  %v47_v48 = vld [vmem:[%s934_s0 + $0x70] sm:$0xff] }
   0xc   :  { %v493_v44 = vld [vmem:[%s939_s8] sm:$0xff]  ;;  %v162_v45 = vsel %vm133_vm0, %v54_v38, 0  ;;  %v55_v46 = vpack.c.bf16 %v46_v42, %v45_v41  ;;  %v494_v47 = vld [vmem:[%s939_s8 + $0x8] sm:$0xff]  ;;  %v48_v49 = vld [vmem:[%s934_s0 + $0x78] sm:$0xff] }
   0xd   :  { %621 = vmatpush3.bf16.xpose.msra.mxu0 %v150_v11  ;;  %95 = vperm.xlu0 %687, %v69_v19   ;;  %v56_v51 = vpack.c.bf16 %v48_v49, %v47_v48  ;;  %v690_v53 = vld [vmem:[%s935_s1 + $0x8] sm:$0xff]   ;;  %v691_v54 = vld [vmem:[%s935_s1 + $0x10] sm:$0xff]   ;;  %v692_v55 = vld [vmem:[%s935_s1 + $0x18] sm:$0xff]  }
   0xe   :  { %678 = vmatprep.subr.msk.bf16.mxu0 %vm133_vm0, %v51_v12  ;;  %100 = vperm.xlu1 %688, %v70_v20   ;;  %v165_v50 = vsel %vm133_vm0, %v55_v46, 0  ;;  %v693_v56 = vld [vmem:[%s940_s3] sm:$0xff]  }
   0xf   :  { %v168_v52 = vsel %vm133_vm0, %v56_v51, 0  ;;  %650 = vmatprep.mubr.msk.bf16.mxu1 %vm314_vm1, %v693_v56 }
  0x11   :  { %105 = vperm.xlu0 %687, %v71_v23  }
  0x12   :  { %110 = vperm.xlu1 %688, %v72_v24  }
  0x15   :  { %623 = vmatpush3.bf16.xpose.msra.mxu0 %v153_v21  ;;  %263 = vperm.xlu0 %687, %v254_v27  }
  0x16   :  { %679 = vmatprep.subr.msk.bf16.mxu0 %vm133_vm0, %v52_v22  ;;  %268 = vperm.xlu1 %688, %v255_v28  }
  0x19   :  { %273 = vperm.xlu0 %687, %v256_v31   ;;  %v696_v31 = vld [vmem:[%s940_s3 + $0x18] ss:$0 sps:$4 sm:$0xff]  }
  0x1a   :  { %278 = vperm.xlu1 %688, %v257_v32   ;;  %v708_v32 = vmov 0.0  }
  0x1d   :  { %625 = vmatpush3.bf16.xpose.msra.mxu0 %v156_v29  ;;  %283 = vperm.xlu0 %687, %v258_v35   ;;  %v694_v29 = vld [vmem:[%s940_s3 + $0x8] sm:$0xff]  }
  0x1e   :  { %680 = vmatprep.subr.msk.bf16.mxu0 %vm133_vm0, %v53_v30  ;;  %288 = vperm.xlu1 %688, %v259_v36   ;;  %v695_v30 = vld [vmem:[%s940_s3 + $0x10] sm:$0xff]  }
  0x21   :  { %293 = vperm.xlu0 %687, %v260_v39  }
  0x22   :  { %422 = vperm.xlu1 %688, %v418_v40  }
  0x25   :  { %627 = vmatpush3.bf16.xpose.msra.mxu0 %v159_v37  ;;  %427 = vperm.xlu0 %687, %v419_v43  }
  0x26   :  { %681 = vmatprep.subr.msk.bf16.mxu0 %vm133_vm0, %v54_v38  ;;  %497 = vperm.xlu1 %688, %v493_v44  }
  0x29   :  { %502 = vperm.xlu0 %687, %v494_v47  }
  0x2d   :  { %629 = vmatpush3.bf16.xpose.msra.mxu0 %v162_v45 }
  0x2e   :  { %682 = vmatprep.subr.msk.bf16.mxu0 %vm133_vm0, %v55_v46 }
  0x35   :  { %631 = vmatpush3.bf16.xpose.msra.mxu0 %v165_v50 }
  0x36   :  { %683 = vmatprep.subr.msk.bf16.mxu0 %vm133_vm0, %v56_v51 }
  0x3d   :  { %633 = vmatpush3.bf16.xpose.msra.mxu0 %v168_v52 }
  0x44   :  { %635 = vmatmul.mubr.msk.bf16.vlgmr.msra.gmra.mrb[0].mxu0 %vm133_vm0, %v690_v53 }
  0x45   :  { %638 = vmatprep.mubr.msk.bf16.mxu0 %vm133_vm0, %v691_v54 }
  0x4c   :  { %639 = vmatmul.mubr.msk.bf16.gmra.mrb[4].mxu0 %vm133_vm0, %v692_v55 }
  0x84   :  { %v76_v57 = vpop.permute.xlu0 %75 }
  0x85   :  { %v86_v58 = vpop.permute.xlu1 %85 }
  0x88   :  { %v81_v59 = vpop.permute.xlu0 %80 }
  0x89   :  { %v91_v60 = vpop.permute.xlu1 %90 }
  0x8c   :  { %v96_v0 = vpop.permute.xlu0 %95 }
  0x8d   :  { %v101_v5 = vpop.permute.xlu1 %100 }
  0x90   :  { %v106_v12 = vpop.permute.xlu0 %105 }
  0x91   :  { %v111_v17 = vpop.permute.xlu1 %110 }
  0x94   :  { %v264_v33 = vpop.permute.xlu0 %263 }
  0x95   :  { %v269_v34 = vpop.permute.xlu1 %268 }
  0x98   :  { %v274_v35 = vpop.permute.xlu0 %273 }
  0x99   :  { %v279_v37 = vpop.permute.xlu1 %278 }
  0x9c   :  { %v284_v40 = vpop.permute.xlu0 %283 }
  0xa0   :  { %v294_v52 = vpop.permute.xlu0 %293 }
 0x117   :  { %v636_v61 = vpop.f32.mrb[0].mxu0 }
 0x118   :  { %v213_v62 = vadd.f32 %v636_v61, %v86_v58  ;;  %v204_v63 = vpop.f32.mrb[1].mxu0 }
 0x119   :  { %v205_v1 = vadd.f32 %v204_v63, %v76_v57  ;;  %v637_v2 = vpop.f32.mrb[2].mxu0 }
 0x11a   :  { %v216_v3 = vadd.f32 %v637_v2, %v91_v60  ;;  %v207_v4 = vpop.f32.mrb[3].mxu0  ;;  %v237_v7 = vmax.f32 %v213_v62, 0.0  ;;  %v289_v62 = vpop.permute.xlu1 %288 }
 0x11b   :  { %v208_v6 = vadd.f32 %v207_v4, %v81_v59  ;;  %v235_v9 = vmax.f32 %v205_v1, 0.0 }
 0x11c   :  { %v238_v8 = vmax.f32 %v216_v3, 0.0 }
 0x11d   :  { %v236_v10 = vmax.f32 %v208_v6, 0.0 }
 0x11e   :  { %v251_v11 = vpack.c.bf16 %v238_v8, %v237_v7 }
 0x11f   :  { %v640_v13 = vpop.f32.mrb[4].mxu0  ;;  %v250_v14 = vpack.c.bf16 %v236_v10, %v235_v9  ;;  %v697_v10 = vld [vmem:[%s941_s5] sm:$0xff]  }
 0x120   :  { %v229_v15 = vadd.f32 %v640_v13, %v106_v12  ;;  %v220_v16 = vpop.f32.mrb[5].mxu0 }
 0x121   :  { %v221_v18 = vadd.f32 %v220_v16, %v96_v0  ;;  %v641_v19 = vpop.f32.mrb[6].mxu0  ;;  %642 = vmatprep.subr.bf16.mxu1 %v250_v14 }
 0x122   :  { %v232_v20 = vadd.f32 %v641_v19, %v111_v17  ;;  %v223_v21 = vpop.f32.mrb[7].mxu0  ;;  %643 = vmatpush3.bf16.msra.mxu1 %v250_v14  ;;  %v241_v23 = vmax.f32 %v229_v15, 0.0  ;;  %v428_v15 = vpop.permute.xlu0 %427 }
 0x123   :  { %v224_v22 = vadd.f32 %v223_v21, %v101_v5  ;;  %644 = vmatprep.subr.bf16.mxu1 %v251_v11  ;;  %v239_v25 = vmax.f32 %v221_v18, 0.0 }
 0x124   :  { %v242_v24 = vmax.f32 %v232_v20, 0.0 }
 0x125   :  { %v240_v26 = vmax.f32 %v224_v22, 0.0 }
 0x126   :  { %v253_v27 = vpack.c.bf16 %v242_v24, %v241_v23  ;;  %645 = vmatpush3.bf16.msra.mxu1 %v251_v11  ;;  %v423_v11 = vpop.permute.xlu1 %422  ;;  %v698_v24 = vld [vmem:[%s942_s7] sm:$0xff]  }
 0x127   :  { %v252_v28 = vpack.c.bf16 %v240_v26, %v239_v25 }
 0x129   :  { %646 = vmatprep.subr.bf16.mxu1 %v252_v28 }
 0x12a   :  { %647 = vmatpush3.bf16.msra.mxu1 %v252_v28  ;;  %v498_v25 = vpop.permute.xlu1 %497 }
 0x12b   :  { %648 = vmatprep.subr.bf16.mxu1 %v253_v27 }
 0x12e   :  { %649 = vmatpush3.bf16.msra.mxu1 %v253_v27 }
 0x12f   :  { %658 = vmatprep.subr.bf16.mxu1 %v708_v32 }
 0x131   :  { %651 = vmatmul.mubr.msk.bf16.vlgmr.msra.gmra.mrb[0].mxu1 %vm314_vm1, %v694_v29  ;;  %v503_v29 = vpop.permute.xlu0 %502 }
 0x132   :  { %654 = vmatprep.mubr.msk.bf16.mxu1 %vm314_vm1, %v695_v30 }
 0x139   :  { %655 = vmatmul.mubr.msk.bf16.gmra.mrb[4].mxu1 %vm314_vm1, %v696_v31 }
 0x13a   :  { %666 = vmatprep.mubr.msk.bf16.mxu1 %vm709_vm2, %v708_v32 }
 0x204   :  { %v652_v36 = vpop.f32.mrb[0].mxu1 }
 0x205   :  { %v370_v38 = vadd.f32 %v652_v36, %v274_v35  ;;  %v361_v39 = vpop.f32.mrb[1].mxu1 }
 0x206   :  { %v362_v41 = vadd.f32 %v361_v39, %v264_v33  ;;  %v653_v42 = vpop.f32.mrb[2].mxu1 }
 0x207   :  { %v400_v43 = vmul.f32 0.01, %v370_v38  ;;  %v373_v44 = vadd.f32 %v653_v42, %v279_v37  ;;  %v364_v45 = vpop.f32.mrb[3].mxu1  ;;  %vm393_vm3 = vcmp.gt.f32.partialorder %v370_v38, 0.0 }
 0x208   :  { %v398_v46 = vmul.f32 0.01, %v362_v41  ;;  %v365_v47 = vadd.f32 %v364_v45, %v269_v34  ;;  %vm391_vm4 = vcmp.gt.f32.partialorder %v362_v41, 0.0 }
 0x209   :  { %vm394_vm5 = vcmp.gt.f32.partialorder %v373_v44, 0.0  ;;  %v401_v48 = vmul.f32 0.01, %v373_v44  ;;  %v407_v50 = vsel %vm393_vm3, %v370_v38, %v400_v43 }
 0x20a   :  { %vm392_vm6 = vcmp.gt.f32.partialorder %v365_v47, 0.0  ;;  %v399_v49 = vmul.f32 0.01, %v365_v47  ;;  %v405_v53 = vsel %vm391_vm4, %v362_v41, %v398_v46 }
 0x20b   :  { %v408_v51 = vsel %vm394_vm5, %v373_v44, %v401_v48 }
 0x20c   :  { %v415_v54 = vpack.c.bf16 %v408_v51, %v407_v50  ;;  %v406_v55 = vsel %vm392_vm6, %v365_v47, %v399_v49  ;;  %v656_v56 = vpop.f32.mrb[4].mxu1 }
 0x20d   :  { %v414_v57 = vpack.c.bf16 %v406_v55, %v405_v53  ;;  %v386_v58 = vadd.f32 %v656_v56, %v294_v52  ;;  %v377_v59 = vpop.f32.mrb[5].mxu1 }
 0x20e   :  { %v378_v60 = vadd.f32 %v377_v59, %v284_v40  ;;  %v657_v61 = vpop.f32.mrb[6].mxu1 }
 0x20f   :  { %v404_v63 = vmul.f32 0.01, %v386_v58  ;;  %v380_v0 = vpop.f32.mrb[7].mxu1  ;;  %659 = vmatpush3.bf16.msra.mxu1 %v414_v57  ;;  %vm397_vm7 = vcmp.gt.f32.partialorder %v386_v58, 0.0 }
 0x210   :  { %v402_v1 = vmul.f32 0.01, %v378_v60  ;;  %v381_v2 = vadd.f32 %v380_v0, %v289_v62  ;;  %660 = vmatprep.subr.bf16.mxu1 %v708_v32  ;;  %vm395_vm8 = vcmp.gt.f32.partialorder %v378_v60, 0.0 }
 0x211   :  { %v411_v4 = vsel %vm397_vm7, %v386_v58, %v404_v63 }
 0x212   :  { %vm396_vm9 = vcmp.gt.f32.partialorder %v381_v2, 0.0  ;;  %v403_v3 = vmul.f32 0.01, %v381_v2  ;;  %v409_v5 = vsel %vm395_vm8, %v378_v60, %v402_v1  ;;  %v417_v8 = vpack.c.bf16 %v411_v4, %v411_v4 }
 0x213   :  { %661 = vmatpush3.bf16.msra.mxu1 %v415_v54 }
 0x214   :  { %v410_v6 = vsel %vm396_vm9, %v381_v2, %v403_v3  ;;  %662 = vmatprep.subr.bf16.mxu1 %v708_v32  ;;  %v441_v9 = vsel %vm439_vm10, %v417_v8, 0 }
 0x215   :  { %v416_v7 = vpack.c.bf16 %v410_v6, %v409_v5 }
 0x217   :  { %663 = vmatpush3.bf16.msra.mxu1 %v416_v7 }
 0x218   :  { %664 = vmatprep.subr.bf16.mxu1 %v708_v32 }
 0x21b   :  { %665 = vmatpush3.bf16.msra.mxu1 %v441_v9 }
 0x21c   :  { %670 = vmatprep.subr.bf16.mxu1 %v708_v32 }
 0x21e   :  { %667 = vmatmul.mubr.msk.bf16.vlgmr.msra.gmra.mrb[8].mxu1 %vm435_vm11, %v697_v10 }
 0x21f   :  { %672 = vmatprep.mubr.msk.bf16.mxu1 %vm709_vm2, %v708_v32 }
 0x2f1   :  { %v477_v12 = vpop.f32.mrb[8].mxu1 }
 0x2f2   :  { %v478_v13 = vadd.f32 %v477_v12, %v423_v11  ;;  %v668_v14 = vpop.f32.mrb[9].mxu1 }
 0x2f3   :  { %v480_v16 = vpop.f32.mrb[10].mxu1 }
 0x2f4   :  { %v486_v17 = vmul.f32 0.01, %v478_v13  ;;  %v481_v18 = vadd.f32 %v480_v16, %v428_v15  ;;  %v669_v19 = vpop.f32.mrb[11].mxu1  ;;  %vm484_vm12 = vcmp.gt.f32.partialorder %v478_v13, 0.0 }
 0x2f6   :  { %vm485_vm13 = vcmp.gt.f32.partialorder %v481_v18, 0.0  ;;  %v487_v20 = vmul.f32 0.01, %v481_v18  ;;  %v488_v21 = vsel %vm484_vm12, %v478_v13, %v486_v17 }
 0x2f8   :  { %v489_v22 = vsel %vm485_vm13, %v481_v18, %v487_v20 }
 0x2f9   :  { %v492_v23 = vpack.c.bf16 %v489_v22, %v488_v21 }
 0x2fb   :  { %671 = vmatpush3.bf16.msra.mxu1 %v492_v23 }
 0x2fe   :  { %673 = vmatmul.mubr.msk.bf16.vlgmr.msra.gmra.mrb[12].mxu1 %vm510_vm14, %v698_v24 }
 0x3d1   :  { %v548_v26 = vpop.f32.mrb[12].mxu1 }
 0x3d2   :  { %v549_v27 = vadd.f32 %v548_v26, %v498_v25  ;;  %v674_v28 = vpop.f32.mrb[13].mxu1 }
 0x3d3   :  { %v551_v30 = vpop.f32.mrb[14].mxu1 }
 0x3d4   :  { %v555_v31 = vsub.f32 0.0, %v549_v27  ;;  %v552_v32 = vadd.f32 %v551_v30, %v503_v29  ;;  %v675_v33 = vpop.f32.mrb[15].mxu1 }
 0x3d6   :  { %v557_v34 = vmul.f32 1.442695, %v555_v31  ;;  %v556_v35 = vsub.f32 0.0, %v552_v32 }
 0x3d8   :  { %699 = vpow2.f32 %v557_v34  ;;  %v559_v36 = vmul.f32 1.442695, %v556_v35 }
 0x3da   :  { %701 = vpow2.f32 %v559_v36 }
 0x3e2   :  { %v700_v37 = vpop.eup %699 }
 0x3e3   :  { %v561_v38 = vadd.f32 1.0, %v700_v37 }
 0x3e4   :  { %v702_v39 = vpop.eup %701 }
 0x3e5   :  { %703 = vrcp.f32 %v561_v38  ;;  %v562_v40 = vadd.f32 1.0, %v702_v39 }
 0x3e7   :  { %705 = vrcp.f32 %v562_v40 }
 0x3ef   :  { %v704_v41 = vpop.eup %703 }
 0x3f0   :  { %565 = vst [vmem:[%s943_s9] sm:$0xff] %v704_v41 }
 0x3f1   :  { %v706_v42 = vpop.eup %705 }
 0x3f2   :  { %566 = vst [vmem:[%s943_s9 + $0x8] sm:$0xff] %v706_v42 }

</bundles_post_ra>
